<compile_context>
chip_gen: v5e
topology: v5e:2x2
jax: 0.10.0
libtpu: 0.0.40
codegen_flags: <defaults>
</compile_context>

<pallas_src>
import functools

import jax
import jax.numpy as jnp
from jax import lax
from jax.experimental import pallas as pl
from jax.experimental.pallas import tpu as pltpu


# ----------------------------------------------------------------------------
# Fused Pallas kernel: embeddings + L MP layers + head
# ----------------------------------------------------------------------------
def _zinc_fused_kernel(
    # grid-constant inputs
    xpe_ref,                                          # [N, node_in+pe_in]  f32
    eraw_ref, gs_ref, gd_ref,                         # edge-tile blocked
    pool_ref, invc_ref,                               # per-graph readout
    embw_ref, embb_ref,                               # fused node/PE embedding
    hw1_ref, hb1_ref, hw2_ref, hb2_ref,               # head MLP
    # per-layer stacked weights (blocked on the layer grid axis)
    wm_ref, bm_ref, we_ref, wu_ref, bu_ref,
    # outputs
    out_ref, pout_ref,
    # VMEM scratch (persists across the whole grid)
    hp_scr, acc_scr,
    *, dh,
):
    l = pl.program_id(0)
    k = pl.program_id(1)
    n_layers = pl.num_programs(0)
    n_etiles = pl.num_programs(1)

    # ---- embeddings: only at the very first grid step -----------------------
    @pl.when(jnp.logical_and(l == 0, k == 0))
    def _embed():
        hp_scr[...] = (jnp.dot(xpe_ref[...], embw_ref[...],
                               preferred_element_type=jnp.float32)
                       + embb_ref[...])

    # ---- zero the per-layer scatter accumulator ------------------------------
    @pl.when(k == 0)
    def _zero_acc():
        acc_scr[...] = jnp.zeros_like(acc_scr)

    # ---- per-edge-tile message computation -----------------------------------
    hp = hp_scr[...]                                  # [N, Dh+Dp] f32
    hp_bf = hp.astype(jnp.bfloat16)
    gs = gs_ref[...]                                  # [TE, N] bf16 one-hot (src)
    gd = gd_ref[...]                                  # [TE, N] bf16 one-hot (dst)

    # gather node state onto edges: bf16 MXU, f32 accumulation
    src_f = jnp.dot(gs, hp_bf, preferred_element_type=jnp.float32)   # [TE, D]
    dst_f = jnp.dot(gd, hp_bf, preferred_element_type=jnp.float32)   # [TE, D]

    # fused message + PE-message GEMM (K = 2*(Dh+Dp)); the linear edge
    # embedding is folded in as a VPU broadcast mul-add (we_ref / bm_ref).
    msg_in = jnp.concatenate([src_f, dst_f], axis=1)                  # [TE, 2D]
    pre = (jnp.dot(msg_in, wm_ref[0], preferred_element_type=jnp.float32)
           + eraw_ref[...] * we_ref[0] + bm_ref[0])                   # [TE, D]
    col = lax.broadcasted_iota(jnp.int32, pre.shape, 1)
    act = jnp.where(col < dh, jnp.maximum(pre, 0.0), jnp.tanh(pre))   # ReLU|tanh

    # scatter-add to destination nodes: contract over the edge axis of gd
    # (gd.T is never materialized or DMA'd)
    acc_scr[...] += lax.dot_general(gd, act.astype(jnp.bfloat16),
                                    (((0,), (0,)), ((), ())),
                                    preferred_element_type=jnp.float32)

    # ---- fused node / PE update after the last edge tile of this layer -------
    @pl.when(k == n_etiles - 1)
    def _update():
        upd_in = jnp.concatenate([hp, acc_scr[...]], axis=1)          # [N, 2D]
        new = hp + (jnp.dot(upd_in, wu_ref[0],
                            preferred_element_type=jnp.float32) + bu_ref[0])
        coln = lax.broadcasted_iota(jnp.int32, new.shape, 1)
        hp_scr[...] = jnp.where(coln < dh, jnp.maximum(new, 0.0), jnp.tanh(new))

    # ---- head: per-graph mean pool + 2-layer MLP, at the very last step ------
    @pl.when(jnp.logical_and(l == n_layers - 1, k == n_etiles - 1))
    def _head():
        hp_fin = hp_scr[...]
        pooled = (jnp.dot(pool_ref[...], hp_fin.astype(jnp.bfloat16),
                          preferred_element_type=jnp.float32)
                  * invc_ref[...])                                    # [G, D]
        z = jnp.maximum(jnp.dot(pooled, hw1_ref[...],
                                preferred_element_type=jnp.float32) + hb1_ref[...],
                        0.0)
        out_ref[...] = (jnp.dot(z, hw2_ref[...],
                                preferred_element_type=jnp.float32) + hb2_ref[...])
        pout_ref[...] = hp_fin[:, dh:]


# ----------------------------------------------------------------------------
# Parameter construction (deterministic, in-script) — same math as before
# ----------------------------------------------------------------------------
def init_params(key, node_in, edge_in, pe_in, dh, dp, dm, num_layers):
    def w(k, shape, scale=0.1):
        return scale * jax.random.normal(k, shape, dtype=jnp.float32)

    keys = iter(jax.random.split(key, 64))
    params = {
        "emb_h_w": w(next(keys), (node_in, dh)), "emb_h_b": jnp.zeros((1, dh), jnp.float32),
        "emb_e_w": w(next(keys), (edge_in, dh)), "emb_e_b": jnp.zeros((1, dh), jnp.float32),
        "emb_p_w": w(next(keys), (pe_in, dp)),   "emb_p_b": jnp.zeros((1, dp), jnp.float32),
        "layers": [],
        "head": {
            "w1h": w(next(keys), (dh, dm)), "w1p": w(next(keys), (dp, dm)),
            "b1": jnp.zeros((1, dm), jnp.float32),
            "w2": w(next(keys), (dm, 1)), "b2": jnp.zeros((1, 1), jnp.float32),
        },
    }
    for _ in range(num_layers):
        lp = {
            "w_ms": w(next(keys), (dh, dh)), "w_md": w(next(keys), (dh, dh)),
            "w_me": w(next(keys), (dh, dh)),
            "w_mps": w(next(keys), (dp, dh)), "w_mpd": w(next(keys), (dp, dh)),
            "b_m": jnp.zeros((1, dh), jnp.float32),
            "w_hs": w(next(keys), (dh, dh)), "w_ha": w(next(keys), (dh, dh)),
            "b_h": jnp.zeros((1, dh), jnp.float32),
            "w_qs": w(next(keys), (dp, dp)), "w_qd": w(next(keys), (dp, dp)),
            "b_q": jnp.zeros((1, dp), jnp.float32),
            "w_ps": w(next(keys), (dp, dp)), "w_pa": w(next(keys), (dp, dp)),
            "b_p": jnp.zeros((1, dp), jnp.float32),
        }
        params["layers"].append(lp)
    return params


def _fuse_params(params, dh, dp):
    """Pack per-layer sub-weights into block-structured fused GEMMs (exact)."""
    d = dh + dp
    eew, eeb = params["emb_e_w"], params["emb_e_b"]     # [1, Dh], [1, Dh]
    wm_l, bm_l, we_l, wu_l, bu_l = [], [], [], [], []
    for lp in params["layers"]:
        # message GEMM: rows [h_src | p_src | h_dst | p_dst], cols [m | q]
        wm = jnp.zeros((2 * d, d), jnp.float32)
        wm = wm.at[0:dh, 0:dh].set(lp["w_ms"])
        wm = wm.at[dh:d, 0:dh].set(lp["w_mps"])
        wm = wm.at[d:d + dh, 0:dh].set(lp["w_md"])
        wm = wm.at[d + dh:2 * d, 0:dh].set(lp["w_mpd"])
        wm = wm.at[dh:d, dh:d].set(lp["w_qs"])
        wm = wm.at[d + dh:2 * d, dh:d].set(lp["w_qd"])
        wm_l.append(wm)
        # exact fold of the linear edge embedding through w_me:
        #   e_emb @ w_me = e_raw * (eew @ w_me) + (eeb @ w_me)
        we = jnp.zeros((1, d), jnp.float32).at[:, 0:dh].set(jnp.dot(eew, lp["w_me"]))
        we_l.append(we)
        bm = jnp.zeros((1, d), jnp.float32)
        bm = bm.at[:, 0:dh].set(lp["b_m"] + jnp.dot(eeb, lp["w_me"]))
        bm = bm.at[:, dh:d].set(lp["b_q"])
        bm_l.append(bm)
        # update GEMM: rows [h | p | agg_h | agg_p], cols [h | p]
        wu = jnp.zeros((2 * d, d), jnp.float32)
        wu = wu.at[0:dh, 0:dh].set(lp["w_hs"])
        wu = wu.at[dh:d, dh:d].set(lp["w_ps"])
        wu = wu.at[d:d + dh, 0:dh].set(lp["w_ha"])
        wu = wu.at[d + dh:2 * d, dh:d].set(lp["w_pa"])
        wu_l.append(wu)
        bu_l.append(jnp.concatenate([lp["b_h"], lp["b_p"]], axis=1))
    node_in = params["emb_h_w"].shape[0]
    pe_in = params["emb_p_w"].shape[0]
    w_emb = jnp.zeros((node_in + pe_in, d), jnp.float32)
    w_emb = w_emb.at[0:node_in, 0:dh].set(params["emb_h_w"])
    w_emb = w_emb.at[node_in:, dh:d].set(params["emb_p_w"])
    b_emb = jnp.concatenate([params["emb_h_b"], params["emb_p_b"]], axis=1)
    w1 = jnp.concatenate([params["head"]["w1h"], params["head"]["w1p"]], axis=0)
    return dict(wm=jnp.stack(wm_l), bm=jnp.stack(bm_l), we=jnp.stack(we_l),
                wu=jnp.stack(wu_l), bu=jnp.stack(bu_l),
                w_emb=w_emb, b_emb=b_emb, w1=w1)


# ----------------------------------------------------------------------------
# Forward pass (mirrors ZINCModel.forward) — single pallas_call
# ----------------------------------------------------------------------------
def zinc_model_forward(params, x, edge_index, edge_attr, batch, pe, num_graphs,
                       edge_tile=None):
    n_nodes = x.shape[0]
    n_edges = edge_index.shape[1]
    dh = params["emb_h_w"].shape[1]
    dp = params["emb_p_w"].shape[1]
    dm = params["head"]["w1h"].shape[1]
    n_layers = len(params["layers"])
    d = dh + dp
    assert params["emb_e_w"].shape[0] == 1  # edge_attr.unsqueeze(1) -> edge_in == 1

    # extract_gnn_args: h = x.float(); e = edge_attr.unsqueeze(1).float()
    xpe = jnp.concatenate([x.astype(jnp.float32), pe.astype(jnp.float32)], axis=1)
    e_raw = edge_attr.astype(jnp.float32)[:, None]            # [E, 1]

    # connectivity -> dense one-hot operands in bf16 (exact 0/1; f32 accumulate
    # in-kernel).  gd.T is NOT built — the kernel contracts over gd's edge axis
    # for the scatter-add.
    src, dst = edge_index[0], edge_index[1]
    gs = jax.nn.one_hot(src, n_nodes, dtype=jnp.bfloat16)     # [E, N]
    gd = jax.nn.one_hot(dst, n_nodes, dtype=jnp.bfloat16)     # [E, N]
    pool_f32 = jax.nn.one_hot(batch, num_graphs, dtype=jnp.float32).T   # [G, N]
    invc = 1.0 / jnp.maximum(pool_f32.sum(axis=1, keepdims=True), 1.0)  # [G, 1]
    pool = pool_f32.astype(jnp.bfloat16)

    # edge_tile < n_edges must be a multiple of 8 (sublane tiling).
    edge_tile = n_edges if edge_tile is None else edge_tile
    assert n_edges % edge_tile == 0, "edge count must be divisible by edge_tile"
    n_etiles = n_edges // edge_tile

    fp = _fuse_params(params, dh, dp)

    const2 = lambda shape: pl.BlockSpec(shape, lambda l, k: (0, 0))
    layer3 = lambda shape: pl.BlockSpec(shape, lambda l, k: (l, 0, 0))
    etile2 = lambda shape: pl.BlockSpec(shape, lambda l, k: (k, 0))

    in_specs = [
        const2(xpe.shape),                      # xpe
        etile2((edge_tile, 1)),                 # e_raw
        etile2((edge_tile, n_nodes)),           # gs
        etile2((edge_tile, n_nodes)),           # gd
        const2((num_graphs, n_nodes)),          # pool
        const2((num_graphs, 1)),                # invc
        const2(fp["w_emb"].shape),              # fused embedding W
        const2((1, d)),                         # fused embedding b
        const2((d, dm)),                        # head w1 (fused [w1h; w1p])
        const2((1, dm)),                        # head b1
        const2((dm, 1)),                        # head w2
        const2((1, 1)),                         # head b2
        layer3((1, 2 * d, d)),                  # wm (message + PE-message)
        layer3((1, 1, d)),                      # bm
        layer3((1, 1, d)),                      # we (folded edge embedding)
        layer3((1, 2 * d, d)),                  # wu (h-update + p-update)
        layer3((1, 1, d)),                      # bu
    ]
    out_specs = (
        pl.BlockSpec((num_graphs, 1), lambda l, k: (0, 0)),
        pl.BlockSpec((n_nodes, dp), lambda l, k: (0, 0)),
    )
    scratch_shapes = [
        pltpu.VMEM((n_nodes, d), jnp.float32),   # hp = [h | p]
        pltpu.VMEM((n_nodes, d), jnp.float32),   # scatter accumulator [agg_h | agg_p]
    ]

    out, p_final = pl.pallas_call(
        functools.partial(_zinc_fused_kernel, dh=dh),
        out_shape=(jax.ShapeDtypeStruct((num_graphs, 1), jnp.float32),
                   jax.ShapeDtypeStruct((n_nodes, dp), jnp.float32)),
        grid_spec=pltpu.PrefetchScalarGridSpec(
            num_scalar_prefetch=0,
            grid=(n_layers, n_etiles),
            in_specs=in_specs,
            out_specs=out_specs,
            scratch_shapes=scratch_shapes),
        compiler_params=pltpu.CompilerParams(
            dimension_semantics=("arbitrary", "arbitrary"),
            vmem_limit_bytes=32 * 1024 * 1024),
    )(xpe, e_raw, gs, gd, pool, invc,
      fp["w_emb"], fp["b_emb"], fp["w1"],
      params["head"]["b1"], params["head"]["w2"], params["head"]["b2"],
      fp["wm"], fp["bm"], fp["we"], fp["wu"], fp["bu"])
    return out, p_final


# ----------------------------------------------------------------------------
# Driver
# ----------------------------------------------------------------------------
if __name__ == "__main__":
    key = jax.random.PRNGKey(0)
    k_x, k_e, k_ei, k_pe, k_p = jax.random.split(key, 5)

    # small synthetic ZINC-like graph batch
    N_NODES, N_EDGES, N_GRAPHS = 16, 32, 2
    NODE_IN, EDGE_IN, PE_IN = 8, 1, 8
    D_H, D_P, D_M, N_LAYERS = 32, 16, 32, 2

    x = jax.random.normal(k_x, (N_NODES, NODE_IN), dtype=jnp.float32)      # graph.x
    edge_attr = jax.random.normal(k_e, (N_EDGES,), dtype=jnp.float32)      # graph.edge_attr
    edge_index = jax.random.randint(k_ei, (2, N_EDGES), 0, N_NODES,
                                    dtype=jnp.int32)                       # graph.edge_index
    batch = jnp.concatenate([jnp.zeros((N_NODES // 2,), jnp.int32),
                             jnp.ones((N_NODES // 2,), jnp.int32)])        # graph.batch
    pe = jax.random.normal(k_pe, (N_NODES, PE_IN), dtype=jnp.float32)      # cc_random_walk_pe

    params = init_params(k_p, NODE_IN, EDGE_IN, PE_IN, D_H, D_P, D_M, N_LAYERS)

    out, p_final = zinc_model_forward(params, x, edge_index, edge_attr, batch, pe,
                                      num_graphs=N_GRAPHS)
    jax.block_until_ready(out)
    jax.block_until_ready(p_final)

    assert out.shape == (N_GRAPHS, 1)
    assert p_final.shape == (N_NODES, D_P)
    print("KERNEL_OK")
</pallas_src>

<mosaic_0001>
module attributes {stable_mosaic.version = 11 : i64} {
  func.func @_zinc_fused_kernel(%arg0: i32, %arg1: i32, %arg2: memref<16x16xf32, #tpu.memory_space<vmem>>, %arg3: memref<32x1xf32, #tpu.memory_space<vmem>>, %arg4: memref<32x16xbf16, #tpu.memory_space<vmem>>, %arg5: memref<32x16xbf16, #tpu.memory_space<vmem>>, %arg6: memref<2x16xbf16, #tpu.memory_space<vmem>>, %arg7: memref<2x1xf32, #tpu.memory_space<vmem>>, %arg8: memref<16x48xf32, #tpu.memory_space<vmem>>, %arg9: memref<1x48xf32, #tpu.memory_space<vmem>>, %arg10: memref<48x32xf32, #tpu.memory_space<vmem>>, %arg11: memref<1x32xf32, #tpu.memory_space<vmem>>, %arg12: memref<32x1xf32, #tpu.memory_space<vmem>>, %arg13: memref<1x1xf32, #tpu.memory_space<vmem>>, %arg14: memref<1x96x48xf32, #tpu.memory_space<vmem>>, %arg15: memref<1x1x48xf32, #tpu.memory_space<vmem>>, %arg16: memref<1x1x48xf32, #tpu.memory_space<vmem>>, %arg17: memref<1x96x48xf32, #tpu.memory_space<vmem>>, %arg18: memref<1x1x48xf32, #tpu.memory_space<vmem>>, %arg19: memref<2x1xf32, #tpu.memory_space<vmem>>, %arg20: memref<16x16xf32, #tpu.memory_space<vmem>>, %arg21: memref<16x48xf32, #tpu.memory_space<vmem>>, %arg22: memref<16x48xf32, #tpu.memory_space<vmem>>) attributes {dimension_semantics = [#tpu.dimension_semantics<arbitrary>, #tpu.dimension_semantics<arbitrary>], iteration_bounds = array<i64: 2, 1>, scalar_prefetch = 0 : i64, scratch_operands = 2 : i64, tpu.core_type = #tpu.core_type<tc>, window_params = [{pipeline_mode = #tpu.pipeline_mode<synchronous>, transform_indices = @transform_0, window_bounds = array<i64: 16, 16>}, {transform_indices = @transform_1, window_bounds = array<i64: 32, 1>}, {transform_indices = @transform_2, window_bounds = array<i64: 32, 16>}, {transform_indices = @transform_3, window_bounds = array<i64: 32, 16>}, {pipeline_mode = #tpu.pipeline_mode<synchronous>, transform_indices = @transform_4, window_bounds = array<i64: 2, 16>}, {pipeline_mode = #tpu.pipeline_mode<synchronous>, transform_indices = @transform_5, window_bounds = array<i64: 2, 1>}, {pipeline_mode = #tpu.pipeline_mode<synchronous>, transform_indices = @transform_6, window_bounds = array<i64: 16, 48>}, {pipeline_mode = #tpu.pipeline_mode<synchronous>, transform_indices = @transform_7, window_bounds = array<i64: 1, 48>}, {pipeline_mode = #tpu.pipeline_mode<synchronous>, transform_indices = @transform_8, window_bounds = array<i64: 48, 32>}, {pipeline_mode = #tpu.pipeline_mode<synchronous>, transform_indices = @transform_9, window_bounds = array<i64: 1, 32>}, {pipeline_mode = #tpu.pipeline_mode<synchronous>, transform_indices = @transform_10, window_bounds = array<i64: 32, 1>}, {pipeline_mode = #tpu.pipeline_mode<synchronous>, transform_indices = @transform_11, window_bounds = array<i64: 1, 1>}, {transform_indices = @transform_12, window_bounds = array<i64: 1, 96, 48>}, {transform_indices = @transform_13, window_bounds = array<i64: 1, 1, 48>}, {transform_indices = @transform_14, window_bounds = array<i64: 1, 1, 48>}, {transform_indices = @transform_15, window_bounds = array<i64: 1, 96, 48>}, {transform_indices = @transform_16, window_bounds = array<i64: 1, 1, 48>}, {pipeline_mode = #tpu.pipeline_mode<synchronous>, transform_indices = @transform_17, window_bounds = array<i64: 2, 1>}, {pipeline_mode = #tpu.pipeline_mode<synchronous>, transform_indices = @transform_18, window_bounds = array<i64: 16, 16>}]} {
    %c0_i32 = arith.constant 0 : i32
    %0 = arith.cmpi eq, %arg0, %c0_i32 : i32
    %c0_i32_0 = arith.constant 0 : i32
    %1 = arith.cmpi eq, %arg1, %c0_i32_0 : i32
    %2 = arith.andi %0, %1 : i1
    %3 = arith.extui %2 : i1 to i32
    %c0_i32_1 = arith.constant 0 : i32
    %4 = arith.cmpi ne, %3, %c0_i32_1 : i32
    scf.if %4 {
      %c0_32 = arith.constant 0 : index
      %c0_33 = arith.constant 0 : index
      %49 = vector.load %arg2[%c0_32, %c0_33] : memref<16x16xf32, #tpu.memory_space<vmem>>, vector<16x16xf32>
      %c0_34 = arith.constant 0 : index
      %c0_35 = arith.constant 0 : index
      %50 = vector.load %arg8[%c0_34, %c0_35] : memref<16x48xf32, #tpu.memory_space<vmem>>, vector<16x48xf32>
      %cst_36 = arith.constant dense<0.000000e+00> : vector<16x48xf32>
      %51 = tpu.matmul %49, %50, %cst_36 {dimension_numbers = #tpu.dot_dimension_numbers<[1], [0], [0], [1], [0, 0, 1, 1], [], []>} : vector<16x16xf32>, vector<16x48xf32>, vector<16x48xf32> -> vector<16x48xf32>
      %c0_37 = arith.constant 0 : index
      %c0_38 = arith.constant 0 : index
      %52 = vector.load %arg9[%c0_37, %c0_38] : memref<1x48xf32, #tpu.memory_space<vmem>>, vector<1x48xf32>
      %53 = vector.broadcast %52 : vector<1x48xf32> to vector<16x48xf32>
      %54 = arith.addf %51, %53 : vector<16x48xf32>
      %c0_39 = arith.constant 0 : index
      %c0_40 = arith.constant 0 : index
      %55 = vector.load %arg21[%c0_39, %c0_40] : memref<16x48xf32, #tpu.memory_space<vmem>>, vector<16x48xf32>
      tpu.vector_store %arg21[%c0_39, %c0_40], %54 {strides = array<i32>} : memref<16x48xf32, #tpu.memory_space<vmem>>, vector<16x48xf32>,
    } else {
    }
    %c0_i32_2 = arith.constant 0 : i32
    %5 = arith.cmpi eq, %arg1, %c0_i32_2 : i32
    %6 = arith.extui %5 : i1 to i32
    %c0_i32_3 = arith.constant 0 : i32
    %7 = arith.cmpi ne, %6, %c0_i32_3 : i32
    scf.if %7 {
      %cst_32 = arith.constant 0.000000e+00 : f32
      %49 = vector.broadcast %cst_32 : f32 to vector<16x48xf32>
      %c0_33 = arith.constant 0 : index
      %c0_34 = arith.constant 0 : index
      %50 = vector.load %arg22[%c0_33, %c0_34] : memref<16x48xf32, #tpu.memory_space<vmem>>, vector<16x48xf32>
      tpu.vector_store %arg22[%c0_33, %c0_34], %49 {strides = array<i32>} : memref<16x48xf32, #tpu.memory_space<vmem>>, vector<16x48xf32>,
    } else {
    }
    %c0 = arith.constant 0 : index
    %c0_4 = arith.constant 0 : index
    %8 = vector.load %arg21[%c0, %c0_4] : memref<16x48xf32, #tpu.memory_space<vmem>>, vector<16x48xf32>
    %9 = arith.truncf %8 : vector<16x48xf32> to vector<16x48xbf16>
    %c0_5 = arith.constant 0 : index
    %c0_6 = arith.constant 0 : index
    %10 = vector.load %arg4[%c0_5, %c0_6] : memref<32x16xbf16, #tpu.memory_space<vmem>>, vector<32x16xbf16>
    %c0_7 = arith.constant 0 : index
    %c0_8 = arith.constant 0 : index
    %11 = vector.load %arg5[%c0_7, %c0_8] : memref<32x16xbf16, #tpu.memory_space<vmem>>, vector<32x16xbf16>
    %cst = arith.constant dense<0.000000e+00> : vector<32x48xf32>
    %12 = tpu.matmul %10, %9, %cst {dimension_numbers = #tpu.dot_dimension_numbers<[1], [0], [0], [1], [0, 0, 1, 1], [], []>} : vector<32x16xbf16>, vector<16x48xbf16>, vector<32x48xf32> -> vector<32x48xf32>
    %cst_9 = arith.constant dense<0.000000e+00> : vector<32x48xf32>
    %13 = tpu.matmul %11, %9, %cst_9 {dimension_numbers = #tpu.dot_dimension_numbers<[1], [0], [0], [1], [0, 0, 1, 1], [], []>} : vector<32x16xbf16>, vector<16x48xbf16>, vector<32x48xf32> -> vector<32x48xf32>
    %14 = tpu.concatenate %12, %13 in 1 : vector<32x48xf32>, vector<32x48xf32> -> vector<32x96xf32>
    %c0_10 = arith.constant 0 : index
    %c0_11 = arith.constant 0 : index
    %c0_12 = arith.constant 0 : index
    %15 = vector.load %arg14[%c0_10, %c0_11, %c0_12] : memref<1x96x48xf32, #tpu.memory_space<vmem>>, vector<1x96x48xf32>
    %16 = vector.shape_cast %15 : vector<1x96x48xf32> to vector<96x48xf32>
    %cst_13 = arith.constant dense<0.000000e+00> : vector<32x48xf32>
    %17 = tpu.matmul %14, %16, %cst_13 {dimension_numbers = #tpu.dot_dimension_numbers<[1], [0], [0], [1], [0, 0, 1, 1], [], []>} : vector<32x96xf32>, vector<96x48xf32>, vector<32x48xf32> -> vector<32x48xf32>
    %c0_14 = arith.constant 0 : index
    %c0_15 = arith.constant 0 : index
    %18 = vector.load %arg3[%c0_14, %c0_15] : memref<32x1xf32, #tpu.memory_space<vmem>>, vector<32x1xf32>
    %c0_16 = arith.constant 0 : index
    %c0_17 = arith.constant 0 : index
    %c0_18 = arith.constant 0 : index
    %19 = vector.load %arg16[%c0_16, %c0_17, %c0_18] : memref<1x1x48xf32, #tpu.memory_space<vmem>>, vector<1x1x48xf32>
    %20 = vector.shape_cast %19 : vector<1x1x48xf32> to vector<1x48xf32>
    %21 = vector.broadcast %18 : vector<32x1xf32> to vector<32x48xf32>
    %22 = vector.broadcast %20 : vector<1x48xf32> to vector<32x48xf32>
    %23 = arith.mulf %21, %22 : vector<32x48xf32>
    %24 = arith.addf %17, %23 : vector<32x48xf32>
    %c0_19 = arith.constant 0 : index
    %c0_20 = arith.constant 0 : index
    %c0_21 = arith.constant 0 : index
    %25 = vector.load %arg15[%c0_19, %c0_20, %c0_21] : memref<1x1x48xf32, #tpu.memory_space<vmem>>, vector<1x1x48xf32>
    %26 = vector.shape_cast %25 : vector<1x1x48xf32> to vector<1x48xf32>
    %27 = vector.broadcast %26 : vector<1x48xf32> to vector<32x48xf32>
    %28 = arith.addf %24, %27 : vector<32x48xf32>
    %29 = tpu.iota {dimensions = array<i32: 1>} : vector<32x48xi32>
    %c32_i32 = arith.constant 32 : i32
    %30 = vector.broadcast %c32_i32 : i32 to vector<32x48xi32>
    %31 = arith.cmpi slt, %29, %30 : vector<32x48xi32>
    %cst_22 = arith.constant 0.000000e+00 : f32
    %32 = vector.broadcast %cst_22 : f32 to vector<32x48xf32>
    %33 = arith.maximumf %28, %32 : vector<32x48xf32>
    %34 = math.tanh %28 : vector<32x48xf32>
    %35 = arith.select %31, %33, %34 : vector<32x48xi1>, vector<32x48xf32>
    %c0_23 = arith.constant 0 : index
    %c0_24 = arith.constant 0 : index
    %36 = vector.load %arg22[%c0_23, %c0_24] : memref<16x48xf32, #tpu.memory_space<vmem>>, vector<16x48xf32>
    %37 = arith.truncf %35 : vector<32x48xf32> to vector<32x48xbf16>
    %cst_25 = arith.constant dense<0.000000e+00> : vector<16x48xf32>
    %38 = tpu.matmul %11, %37, %cst_25 {dimension_numbers = #tpu.dot_dimension_numbers<[0], [0], [1], [1], [0, 1, 1, 1], [], []>} : vector<32x16xbf16>, vector<32x48xbf16>, vector<16x48xf32> -> vector<16x48xf32>
    %39 = arith.addf %36, %38 : vector<16x48xf32>
    %c0_26 = arith.constant 0 : index
    %c0_27 = arith.constant 0 : index
    %40 = vector.load %arg22[%c0_26, %c0_27] : memref<16x48xf32, #tpu.memory_space<vmem>>, vector<16x48xf32>
    tpu.vector_store %arg22[%c0_26, %c0_27], %39 {strides = array<i32>} : memref<16x48xf32, #tpu.memory_space<vmem>>, vector<16x48xf32>,
    %c0_i32_28 = arith.constant 0 : i32
    %41 = arith.cmpi eq, %arg1, %c0_i32_28 : i32
    %42 = arith.extui %41 : i1 to i32
    %c0_i32_29 = arith.constant 0 : i32
    %43 = arith.cmpi ne, %42, %c0_i32_29 : i32
    scf.if %43 {
      %c0_32 = arith.constant 0 : index
      %c0_33 = arith.constant 0 : index
      %49 = vector.load %arg22[%c0_32, %c0_33] : memref<16x48xf32, #tpu.memory_space<vmem>>, vector<16x48xf32>
      %50 = tpu.concatenate %8, %49 in 1 : vector<16x48xf32>, vector<16x48xf32> -> vector<16x96xf32>
      %c0_34 = arith.constant 0 : index
      %c0_35 = arith.constant 0 : index
      %c0_36 = arith.constant 0 : index
      %51 = vector.load %arg17[%c0_34, %c0_35, %c0_36] : memref<1x96x48xf32, #tpu.memory_space<vmem>>, vector<1x96x48xf32>
      %52 = vector.shape_cast %51 : vector<1x96x48xf32> to vector<96x48xf32>
      %cst_37 = arith.constant dense<0.000000e+00> : vector<16x48xf32>
      %53 = tpu.matmul %50, %52, %cst_37 {dimension_numbers = #tpu.dot_dimension_numbers<[1], [0], [0], [1], [0, 0, 1, 1], [], []>} : vector<16x96xf32>, vector<96x48xf32>, vector<16x48xf32> -> vector<16x48xf32>
      %c0_38 = arith.constant 0 : index
      %c0_39 = arith.constant 0 : index
      %c0_40 = arith.constant 0 : index
      %54 = vector.load %arg18[%c0_38, %c0_39, %c0_40] : memref<1x1x48xf32, #tpu.memory_space<vmem>>, vector<1x1x48xf32>
      %55 = vector.shape_cast %54 : vector<1x1x48xf32> to vector<1x48xf32>
      %56 = vector.broadcast %55 : vector<1x48xf32> to vector<16x48xf32>
      %57 = arith.addf %53, %56 : vector<16x48xf32>
      %58 = arith.addf %8, %57 : vector<16x48xf32>
      %59 = tpu.iota {dimensions = array<i32: 1>} : vector<16x48xi32>
      %c32_i32_41 = arith.constant 32 : i32
      %60 = vector.broadcast %c32_i32_41 : i32 to vector<16x48xi32>
      %61 = arith.cmpi slt, %59, %60 : vector<16x48xi32>
      %cst_42 = arith.constant 0.000000e+00 : f32
      %62 = vector.broadcast %cst_42 : f32 to vector<16x48xf32>
      %63 = arith.maximumf %58, %62 : vector<16x48xf32>
      %64 = math.tanh %58 : vector<16x48xf32>
      %65 = arith.select %61, %63, %64 : vector<16x48xi1>, vector<16x48xf32>
      %c0_43 = arith.constant 0 : index
      %c0_44 = arith.constant 0 : index
      %66 = vector.load %arg21[%c0_43, %c0_44] : memref<16x48xf32, #tpu.memory_space<vmem>>, vector<16x48xf32>
      tpu.vector_store %arg21[%c0_43, %c0_44], %65 {strides = array<i32>} : memref<16x48xf32, #tpu.memory_space<vmem>>, vector<16x48xf32>,
    } else {
    }
    %c1_i32 = arith.constant 1 : i32
    %44 = arith.cmpi eq, %arg0, %c1_i32 : i32
    %c0_i32_30 = arith.constant 0 : i32
    %45 = arith.cmpi eq, %arg1, %c0_i32_30 : i32
    %46 = arith.andi %44, %45 : i1
    %47 = arith.extui %46 : i1 to i32
    %c0_i32_31 = arith.constant 0 : i32
    %48 = arith.cmpi ne, %47, %c0_i32_31 : i32
    scf.if %48 {
      %c0_32 = arith.constant 0 : index
      %c0_33 = arith.constant 0 : index
      %49 = vector.load %arg21[%c0_32, %c0_33] : memref<16x48xf32, #tpu.memory_space<vmem>>, vector<16x48xf32>
      %c0_34 = arith.constant 0 : index
      %c0_35 = arith.constant 0 : index
      %50 = vector.load %arg6[%c0_34, %c0_35] : memref<2x16xbf16, #tpu.memory_space<vmem>>, vector<2x16xbf16>
      %51 = arith.truncf %49 : vector<16x48xf32> to vector<16x48xbf16>
      %cst_36 = arith.constant dense<0.000000e+00> : vector<2x48xf32>
      %52 = tpu.matmul %50, %51, %cst_36 {dimension_numbers = #tpu.dot_dimension_numbers<[1], [0], [0], [1], [0, 0, 1, 1], [], []>} : vector<2x16xbf16>, vector<16x48xbf16>, vector<2x48xf32> -> vector<2x48xf32>
      %c0_37 = arith.constant 0 : index
      %c0_38 = arith.constant 0 : index
      %53 = vector.load %arg7[%c0_37, %c0_38] : memref<2x1xf32, #tpu.memory_space<vmem>>, vector<2x1xf32>
      %54 = vector.broadcast %53 : vector<2x1xf32> to vector<2x48xf32>
      %55 = arith.mulf %52, %54 : vector<2x48xf32>
      %c0_39 = arith.constant 0 : index
      %c0_40 = arith.constant 0 : index
      %56 = vector.load %arg10[%c0_39, %c0_40] : memref<48x32xf32, #tpu.memory_space<vmem>>, vector<48x32xf32>
      %cst_41 = arith.constant dense<0.000000e+00> : vector<2x32xf32>
      %57 = tpu.matmul %55, %56, %cst_41 {dimension_numbers = #tpu.dot_dimension_numbers<[1], [0], [0], [1], [0, 0, 1, 1], [], []>} : vector<2x48xf32>, vector<48x32xf32>, vector<2x32xf32> -> vector<2x32xf32>
      %c0_42 = arith.constant 0 : index
      %c0_43 = arith.constant 0 : index
      %58 = vector.load %arg11[%c0_42, %c0_43] : memref<1x32xf32, #tpu.memory_space<vmem>>, vector<1x32xf32>
      %59 = vector.broadcast %58 : vector<1x32xf32> to vector<2x32xf32>
      %60 = arith.addf %57, %59 : vector<2x32xf32>
      %cst_44 = arith.constant 0.000000e+00 : f32
      %61 = vector.broadcast %cst_44 : f32 to vector<2x32xf32>
      %62 = arith.maximumf %60, %61 : vector<2x32xf32>
      %c0_45 = arith.constant 0 : index
      %c0_46 = arith.constant 0 : index
      %63 = vector.load %arg12[%c0_45, %c0_46] : memref<32x1xf32, #tpu.memory_space<vmem>>, vector<32x1xf32>
      %cst_47 = arith.constant dense<0.000000e+00> : vector<2x1xf32>
      %64 = tpu.matmul %62, %63, %cst_47 {dimension_numbers = #tpu.dot_dimension_numbers<[1], [0], [0], [1], [0, 0, 1, 1], [], []>} : vector<2x32xf32>, vector<32x1xf32>, vector<2x1xf32> -> vector<2x1xf32>
      %c0_48 = arith.constant 0 : index
      %c0_49 = arith.constant 0 : index
      %65 = vector.load %arg13[%c0_48, %c0_49] : memref<1x1xf32, #tpu.memory_space<vmem>>, vector<1x1xf32>
      %66 = vector.broadcast %65 : vector<1x1xf32> to vector<2x1xf32>
      %67 = arith.addf %64, %66 : vector<2x1xf32>
      %c0_50 = arith.constant 0 : index
      %c0_51 = arith.constant 0 : index
      %68 = vector.load %arg19[%c0_50, %c0_51] : memref<2x1xf32, #tpu.memory_space<vmem>>, vector<2x1xf32>
      tpu.vector_store %arg19[%c0_50, %c0_51], %67 {strides = array<i32>} : memref<2x1xf32, #tpu.memory_space<vmem>>, vector<2x1xf32>,
      %69 = vector.extract_strided_slice %49 {offsets = [0, 32], sizes = [16, 16], strides = [1, 1]} : vector<16x48xf32> to vector<16x16xf32>
      %c0_52 = arith.constant 0 : index
      %c0_53 = arith.constant 0 : index
      %70 = vector.load %arg20[%c0_52, %c0_53] : memref<16x16xf32, #tpu.memory_space<vmem>>, vector<16x16xf32>
      tpu.vector_store %arg20[%c0_52, %c0_53], %69 {strides = array<i32>} : memref<16x16xf32, #tpu.memory_space<vmem>>, vector<16x16xf32>,
    } else {
    }
    return
  }
  func.func @transform_0(%arg0: i32, %arg1: i32) -> (i32, i32) {
    %c0_i32 = arith.constant 0 : i32
    %c0_i32_0 = arith.constant 0 : i32
    %c0_i32_1 = arith.constant 0 : i32
    return %c0_i32, %c0_i32_0 : i32, i32
  }
  func.func @transform_1(%arg0: i32, %arg1: i32) -> (i32, i32) {
    %c0_i32 = arith.constant 0 : i32
    %c0_i32_0 = arith.constant 0 : i32
    return %arg1, %c0_i32 : i32, i32
  }
  func.func @transform_2(%arg0: i32, %arg1: i32) -> (i32, i32) {
    %c0_i32 = arith.constant 0 : i32
    %c0_i32_0 = arith.constant 0 : i32
    return %arg1, %c0_i32 : i32, i32
  }
  func.func @transform_3(%arg0: i32, %arg1: i32) -> (i32, i32) {
    %c0_i32 = arith.constant 0 : i32
    %c0_i32_0 = arith.constant 0 : i32
    return %arg1, %c0_i32 : i32, i32
  }
  func.func @transform_4(%arg0: i32, %arg1: i32) -> (i32, i32) {
    %c0_i32 = arith.constant 0 : i32
    %c0_i32_0 = arith.constant 0 : i32
    %c0_i32_1 = arith.constant 0 : i32
    return %c0_i32, %c0_i32_0 : i32, i32
  }
  func.func @transform_5(%arg0: i32, %arg1: i32) -> (i32, i32) {
    %c0_i32 = arith.constant 0 : i32
    %c0_i32_0 = arith.constant 0 : i32
    %c0_i32_1 = arith.constant 0 : i32
    return %c0_i32, %c0_i32_0 : i32, i32
  }
  func.func @transform_6(%arg0: i32, %arg1: i32) -> (i32, i32) {
    %c0_i32 = arith.constant 0 : i32
    %c0_i32_0 = arith.constant 0 : i32
    %c0_i32_1 = arith.constant 0 : i32
    return %c0_i32, %c0_i32_0 : i32, i32
  }
  func.func @transform_7(%arg0: i32, %arg1: i32) -> (i32, i32) {
    %c0_i32 = arith.constant 0 : i32
    %c0_i32_0 = arith.constant 0 : i32
    %c0_i32_1 = arith.constant 0 : i32
    return %c0_i32, %c0_i32_0 : i32, i32
  }
  func.func @transform_8(%arg0: i32, %arg1: i32) -> (i32, i32) {
    %c0_i32 = arith.constant 0 : i32
    %c0_i32_0 = arith.constant 0 : i32
    %c0_i32_1 = arith.constant 0 : i32
    return %c0_i32, %c0_i32_0 : i32, i32
  }
  func.func @transform_9(%arg0: i32, %arg1: i32) -> (i32, i32) {
    %c0_i32 = arith.constant 0 : i32
    %c0_i32_0 = arith.constant 0 : i32
    %c0_i32_1 = arith.constant 0 : i32
    return %c0_i32, %c0_i32_0 : i32, i32
  }
  func.func @transform_10(%arg0: i32, %arg1: i32) -> (i32, i32) {
    %c0_i32 = arith.constant 0 : i32
    %c0_i32_0 = arith.constant 0 : i32
    %c0_i32_1 = arith.constant 0 : i32
    return %c0_i32, %c0_i32_0 : i32, i32
  }
  func.func @transform_11(%arg0: i32, %arg1: i32) -> (i32, i32) {
    %c0_i32 = arith.constant 0 : i32
    %c0_i32_0 = arith.constant 0 : i32
    %c0_i32_1 = arith.constant 0 : i32
    return %c0_i32, %c0_i32_0 : i32, i32
  }
  func.func @transform_12(%arg0: i32, %arg1: i32) -> (i32, i32, i32) {
    %c0_i32 = arith.constant 0 : i32
    %c0_i32_0 = arith.constant 0 : i32
    %c0_i32_1 = arith.constant 0 : i32
    return %arg0, %c0_i32, %c0_i32_0 : i32, i32, i32
  }
  func.func @transform_13(%arg0: i32, %arg1: i32) -> (i32, i32, i32) {
    %c0_i32 = arith.constant 0 : i32
    %c0_i32_0 = arith.constant 0 : i32
    %c0_i32_1 = arith.constant 0 : i32
    return %arg0, %c0_i32, %c0_i32_0 : i32, i32, i32
  }
  func.func @transform_14(%arg0: i32, %arg1: i32) -> (i32, i32, i32) {
    %c0_i32 = arith.constant 0 : i32
    %c0_i32_0 = arith.constant 0 : i32
    %c0_i32_1 = arith.constant 0 : i32
    return %arg0, %c0_i32, %c0_i32_0 : i32, i32, i32
  }
  func.func @transform_15(%arg0: i32, %arg1: i32) -> (i32, i32, i32) {
    %c0_i32 = arith.constant 0 : i32
    %c0_i32_0 = arith.constant 0 : i32
    %c0_i32_1 = arith.constant 0 : i32
    return %arg0, %c0_i32, %c0_i32_0 : i32, i32, i32
  }
  func.func @transform_16(%arg0: i32, %arg1: i32) -> (i32, i32, i32) {
    %c0_i32 = arith.constant 0 : i32
    %c0_i32_0 = arith.constant 0 : i32
    %c0_i32_1 = arith.constant 0 : i32
    return %arg0, %c0_i32, %c0_i32_0 : i32, i32, i32
  }
  func.func @transform_17(%arg0: i32, %arg1: i32) -> (i32, i32) {
    %c0_i32 = arith.constant 0 : i32
    %c0_i32_0 = arith.constant 0 : i32
    %c0_i32_1 = arith.constant 0 : i32
    return %c0_i32, %c0_i32_0 : i32, i32
  }
  func.func @transform_18(%arg0: i32, %arg1: i32) -> (i32, i32) {
    %c0_i32 = arith.constant 0 : i32
    %c0_i32_0 = arith.constant 0 : i32
    %c0_i32_1 = arith.constant 0 : i32
    return %c0_i32, %c0_i32_0 : i32, i32
  }
}

</mosaic_0001>

<bundles_post_ra>
// kernel: tpu_custom_call.1
= control target key start
LH: loop header
LB: loop body
LE: loop exit
PB: predicated region body
PF: predicated region fallthrough
CT: control target
= control target key end

     0   :  { %s1875_s0 = inlined_call_operand.vmem [shape: f32[16,16], index: 0, kind: input, shape index: {}]   ;;  %s1876_s1 = inlined_call_operand.vmem [shape: f32[32,1], index: 1, kind: input, shape index: {}]   ;;  %s1877_s2 = inlined_call_operand.vmem [shape: bf16[32,16], index: 2, kind: input, shape index: {}]   ;;  %s1878_s3 = inlined_call_operand.vmem [shape: bf16[32,16], index: 3, kind: input, shape index: {}]   ;;  %s1879_s4 = inlined_call_operand.vmem [shape: bf16[2,16], index: 4, kind: input, shape index: {}]   ;;  %s1880_s5 = inlined_call_operand.vmem [shape: f32[2,1], index: 5, kind: input, shape index: {}]   ;;  %s1881_s6 = inlined_call_operand.vmem [shape: f32[16,48], index: 6, kind: input, shape index: {}]   ;;  %s1882_s7 = inlined_call_operand.vmem [shape: f32[1,48], index: 7, kind: input, shape index: {}]   ;;  %s1883_s8 = inlined_call_operand.vmem [shape: f32[48,32], index: 8, kind: input, shape index: {}]   ;;  %s1884_s9 = inlined_call_operand.vmem [shape: f32[1,32], index: 9, kind: input, shape index: {}]   ;;  %s1885_s10 = inlined_call_operand.vmem [shape: f32[32,1], index: 10, kind: input, shape index: {}]   ;;  %s1886_s11 = inlined_call_operand.<no memory space> [shape: f32[1,1], index: 11, kind: input, shape index: {}]   ;;  %s1887_s12 = inlined_call_operand.vmem [shape: f32[2,96,48], index: 12, kind: input, shape index: {}]   ;;  %s1888_s13 = inlined_call_operand.vmem [shape: f32[2,1,48], index: 13, kind: input, shape index: {}]   ;;  %s1889_s14 = inlined_call_operand.vmem [shape: f32[2,1,48], index: 14, kind: input, shape index: {}]   ;;  %s1890_s15 = inlined_call_operand.vmem [shape: f32[2,96,48], index: 15, kind: input, shape index: {}]   ;;  %s1891_s16 = inlined_call_operand.vmem [shape: f32[2,1,48], index: 16, kind: input, shape index: {}]   ;;  %s1892_s17 = inlined_call_operand.vmem [shape: f32[2,1], index: 17, kind: output, shape index: {0}]   ;;  %s1893_s18 = inlined_call_operand.hbm [shape: f32[16,16], index: 18, kind: output, shape index: {1}]  }
   0x1   :  { %1899 = sst [smem:[#allocation11_spill]] %s1875_s0  ;;  %v24_v0 = vstv %s1886_s11 }
   0x2   :  { %1900 = sst [smem:[#allocation12_spill]] %s1876_s1  ;;  %25 = vst [vmem:[#allocation4] sm:$0x1] %v24_v0 }
   0x3   :  { %1901 = sst [smem:[#allocation13_spill]] %s1877_s2 }
   0x4   :  { %1902 = sst [smem:[#allocation14_spill]] %s1892_s17 }
   0x5   :  { %1903 = sst [smem:[#allocation15_spill]] %s1893_s18 }
   0x6   :  { %26 = vsyncpa [#allocation6], 0  ;;  %s1630_s29 = smov 0   ;;  %s1632_s30 = smov 0  }
   0x7   :  { %s1634_s0 = smov 0  }
   0x8 LB: > { %1904 = sst [smem:[#allocation8_spill]] %s1518_s30  ;;  %s44_s19 = sadd.s32 1, %s1518_s30  ;;  %s1522_s0 = sphi %s1634_s0, %s32_s0   ;;  %s1518_s30 = sphi %s1632_s30, %s1916_s30   ;;  %s1514_s29 = sphi %s1630_s29, %s1915_s29  }
   0x9   : > { %1905 = sst [smem:[#allocation9_spill]] %s1522_s0  ;;  %p46_p0 = scmp.ge.s32.totalorder %s44_s19, 2 }
   0xa   : > { %p1346_p1 = scmp.ge.s32.totalorder %s1522_s0, 1  ;;  %p587_p2 = scmp.lt.s32.totalorder %s1522_s0, 3 }
   0xb   : > { %s1918_s19 = smov (%p46_p0, %s44_s19), 0 }
   0xc   : > { %1906 = sst [smem:[#allocation10_spill]] %s1918_s19  ;;  %p588_p3 = pnand %p1346_p1, %p587_p2 }
   0xd   : > { %p683_p4 = scmp.lt.s32.totalorder (!%p588_p3), %s1514_s29, 1  ;;  %p703_p5 = scmp.eq.s32.totalorder (!%p588_p3), %s1514_s29, 0 }
   0xe   : > { %591 = sbr.rel (%p588_p3) target bundleno = 1416 (0x588), region = 88 }
  0x13   : > { %s1654_s1 = scalar_select %p683_p4, %s1514_s29, 1  ;;  %v712_v1 = vld [vmem:[%s1881_s6 + $0x8] sm:$0xff] (%p703_p5)  ;;  %v711_v2 = vld [vmem:[%s1881_s6] sm:$0xff] (%p703_p5)  ;;  %vm717_vm0 = vcmask (%p703_p5), 130048   ;;  %vm747_vm1 = vcmask (%p703_p5), 392192  }
  0x14   : > { %708 = sbr.rel (!%p703_p5) target bundleno = 157 (0x9d), region = 92  ;;  %738 = vmatpush.msra.mxu0 (%p703_p5), %v712_v1  ;;  %1393 = vmatpush.msra.mxu1 (%p703_p5), %v712_v1  ;;  %s1907_s19 = sld [smem:[#allocation11_spill]] (%p703_p5)  ;;  %v1446_v5 = vld [vmem:[%s1882_s7] ss:$0 sm:$0xff] (%p703_p5) }
  0x15   : > { %s1407_s20 = smul.u32 96, %s1654_s1  ;;  %s690_s2 = scalar_lea.vmem %s1888_s13, %s1654_s1 }
  0x16   : > { %s693_s25 = scalar_lea.vmem %s1889_s14, %s1654_s1  ;;  %s701_s28 = scalar_lea.vmem %s1891_s16, %s1654_s1  ;;  %739 = vmatpush.msra.mxu0 (%p703_p5), %v711_v2  ;;  %1394 = vmatpush.msra.mxu1 (%p703_p5), %v711_v2 }
  0x17   : > { %s1672_s30 = scalar_lea.vmem %s1887_s12, %s1407_s20  ;;  %s1677_s17 = scalar_lea.vmem %s1890_s15, %s1407_s20 }
  0x1a   : > { %v709_v3 = vld [vmem:[%s1907_s19] sm:$0xff]  ;;  %v710_v4 = vld [vmem:[%s1907_s19 + $0x8] sm:$0xff] }
  0x1b   : > { %1350 = vmatmul.msk.f32.vlgmr.msra.gmra.mxu0 %vm717_vm0, %v709_v3  ;;  %1351 = vmatmul.msk.f32.vlgmr.msra.gmra.mxu1 %vm717_vm0, %v710_v4 }
  0x98   : > { %v741_v6 = vpop.f32.mrf.mxu0  ;;  %v744_v7 = vpop.f32.mrf.mxu1 }
  0x99   : > { %v742_v8 = vadd.f32 %v1446_v5, %v741_v6  ;;  %v745_v9 = vadd.f32 %v1446_v5, %v744_v7 }
  0x9b   : > { %748 = vst.msk [vmem:[#allocation2] sm:$0xff] %vm747_vm1, %v742_v8 }
  0x9c   : > { %749 = vst.msk [vmem:[#allocation2 + $0x8] sm:$0xff] %vm747_vm1, %v745_v9 }
  0x9d PF: > { %v1390_v13 = vld [vmem:[%s1878_s3] sm:$0xff]  ;;  %s1908_s26 = sld [smem:[#allocation13_spill]]  ;;  %vm777_vm2 = vcmask 130048   ;;  %v1391_v15 = vld [vmem:[%s1878_s3 + $0x8] sm:$0xff]  ;;  %v870_v19 = vld [vmem:[%s1672_s30 + $0x58] sm:$0xff]  ;;  %v1524_v20 = vmov 0   ;;  %v953_v8 = vlaneseq }
  0x9e   : > { %s1909_s22 = sld [smem:[#allocation12_spill]]  ;;  %1447 = vset.pattern.permute.xlu2 %v1524_v20  ;;  %1395 = vmatpush.msra.mxu2 %v870_v19  ;;  %v869_v21 = vld [vmem:[%s1672_s30 + $0x50] sm:$0xff]  ;;  %v868_v22 = vld [vmem:[%s1672_s30 + $0x48] sm:$0xff]  ;;  %v867_v23 = vld [vmem:[%s1672_s30 + $0x40] sm:$0xff]  ;;  %s1525_s11 = smov 48   ;;  %vm753_vm3 = vcmask 392192  }
  0x9f   : > { %1449 = vset.pattern.permute.xlu1 %v1524_v20  ;;  %1448 = vset.pattern.permute.xlu0 %v1524_v20  ;;  %v866_v24 = vld [vmem:[%s1672_s30 + $0x38] sm:$0xff]  ;;  %v865_v27 = vld [vmem:[%s1672_s30 + $0x30] sm:$0xff]  ;;  %v864_v28 = vld [vmem:[%s1672_s30 + $0x28] sm:$0xff]  ;;  %vm903_vm4 = vcmask 785408   ;;  %v1526_v54 = vmov 0.0   ;;  %vm990_vm6 = vcmask 261120  }
  0xa0   : > { %1396 = vmatpush.msra.mxu2 %v869_v21  ;;  %v863_v29 = vld [vmem:[%s1672_s30 + $0x20] sm:$0xff]  ;;  %v862_v30 = vld [vmem:[%s1672_s30 + $0x18] sm:$0xff]  ;;  %v861_v32 = vld [vmem:[%s1672_s30 + $0x10] sm:$0xff]  ;;  %754 = vst.msk [vmem:[#allocation3] sm:$0xff] %vm753_vm3, %v1526_v54  ;;  %p1082_p6 = scmp.eq.s32.totalorder %s1514_s29, 1 }
  0xa1   : > { %v860_v33 = vld [vmem:[%s1672_s30 + $0x8] sm:$0xff]  ;;  %v859_v35 = vld [vmem:[%s1672_s30] sm:$0xff]  ;;  %755 = vst.msk [vmem:[#allocation3 + $0x8] sm:$0xff] %vm753_vm3, %v1526_v54  ;;  %vm1179_vm7 = vcmask (%p1082_p6), 1024  }
  0xa2   : > { %v1694_v10 = vld [vmem:[#allocation2] sm:$0xff]  ;;  %1397 = vmatpush.msra.mxu2 %v868_v22 }
  0xa3   : > { %v1696_v11 = vld [vmem:[#allocation2 + $0x8] sm:$0xff]  ;;  %v1388_v14 = vld [vmem:[%s1908_s26] sm:$0xff] }
  0xa4   : > { %v758_v12 = vpack.c.bf16 %v1696_v11, %v1694_v10  ;;  %v1389_v16 = vld [vmem:[%s1908_s26 + $0x8] sm:$0xff]  ;;  %v873_v18 = vld [vmem:[%s1909_s22 + $0x10] sm:$0xff]  ;;  %v874_v26 = vld [vmem:[%s1909_s22 + $0x18] sm:$0xff]  ;;  %1398 = vmatpush.msra.mxu2 %v867_v23 }
  0xa5   : > { %888 = vperm.xlu2 %1447, %v873_v18   ;;  %v872_v36 = vld [vmem:[%s1909_s22 + $0x8] sm:$0xff]  ;;  %v871_v38 = vld [vmem:[%s1909_s22] sm:$0xff] }
  0xa6   : > { %826 = vmatpush.bf16.msra.mxu1 %v758_v12  ;;  %791 = vmatpush.bf16.msra.mxu0 %v758_v12  ;;  %v1450_v52 = vld [vmem:[%s693_s25] ss:$0 sm:$0xff]  ;;  %v1764_v12 = vand.u32 127, %v953_v8  ;;  %v1116_v8 = vld [vmem:[%s1883_s8 + $0x10] sm:$0xff] (%p1082_p6)  ;;  %s1910_s25 = sld [smem:[#allocation14_spill]] (%p1082_p6) }
  0xa7   : > { %1399 = vmatpush.msra.mxu2 %v866_v24  ;;  %v1451_v61 = vld [vmem:[%s690_s2] ss:$0 sm:$0xff] }
  0xa8   : > { %vm955_vm5 = vcmp.lt.s32.totalorder %v1764_v12, 32  ;;  %v1114_v12 = vld [vmem:[%s1883_s8] sm:$0xff] (%p1082_p6) }
  0xa9   : > { %1370 = vmatmul.msk.bf16.vlgmr.msra.gmra.mxu1 %vm777_vm2, %v1390_v13  ;;  %1360 = vmatmul.msk.bf16.vlgmr.msra.gmra.mxu0 %vm777_vm2, %v1388_v14 }
  0xaa   : > { %920 = vmatpush.msrb.mxu0 %v870_v19  ;;  %1400 = vmatpush.msra.mxu2 %v865_v27 }
  0xac   : > { %921 = vmatpush.msrb.mxu0 %v869_v21  ;;  %1401 = vmatpush.msra.mxu2 %v864_v28 }
  0xad   : > { %893 = vperm.xlu2 %1447, %v874_v26  }
  0xae   : > { %922 = vmatpush.msrb.mxu0 %v868_v22  ;;  %1402 = vmatpush.msra.mxu2 %v863_v29 }
  0xb0   : > { %923 = vmatpush.msrb.mxu0 %v867_v23  ;;  %1403 = vmatpush.msra.mxu2 %v862_v30 }
  0xb2   : > { %924 = vmatpush.msrb.mxu0 %v866_v24  ;;  %1404 = vmatpush.msra.mxu2 %v861_v32 }
  0xb4   : > { %925 = vmatpush.msrb.mxu0 %v865_v27  ;;  %1405 = vmatpush.msra.mxu2 %v860_v33 }
  0xb6   : > { %926 = vmatpush.msrb.mxu0 %v864_v28  ;;  %1406 = vmatpush.msra.mxu2 %v859_v35  ;;  %v1038_v28 = vld [vmem:[%s1677_s17 + $0x58] sm:$0xff] }
  0xb8   : > { %927 = vmatpush.msrb.mxu0 %v863_v29  ;;  %v1037_v29 = vld [vmem:[%s1677_s17 + $0x50] sm:$0xff] }
  0xb9   : > { %1371 = vmatmul.msk.bf16.gmra.mxu1 %vm777_vm2, %v1391_v15  ;;  %1361 = vmatmul.msk.bf16.gmra.mxu0 %vm777_vm2, %v1389_v16 }
  0xba   : > { %928 = vmatpush.msrb.mxu0 %v862_v30  ;;  %v1036_v30 = vld [vmem:[%s1677_s17 + $0x48] sm:$0xff] }
  0xbc   : > { %929 = vmatpush.msrb.mxu0 %v861_v32  ;;  %v1034_v32 = vld [vmem:[%s1677_s17 + $0x38] sm:$0xff] }
  0xbe   : > { %930 = vmatpush.msrb.mxu0 %v860_v33  ;;  %v1033_v33 = vld [vmem:[%s1677_s17 + $0x30] sm:$0xff] }
  0xc0   : > { %931 = vmatpush.msrb.mxu0 %v859_v35  ;;  %v968_v35 = vld [vmem:[#allocation3] sm:$0xff] }
  0xd3   : > { %974 = vxpose.xlu2.c.b16.start [1/2] (short) (narrow) %v1390_v13, 16 }
  0xe3   : > { %975 = vxpose.xlu2.c.b16.end [2/2] (short) (narrow) %v1391_v15, 16 }
  0xff   : > { %v889_v51 = vpop.permute.xlu2 %888 }
 0x100   : > { %v901_v56 = vmul.f32 %v1450_v52, %v889_v51 }
 0x107   : > { %v894_v59 = vpop.permute.xlu2 %893 }
 0x108   : > { %v902_v63 = vmul.f32 %v1450_v52, %v894_v59 }
 0x126   : > { %v828_v17 = vpop.f32.mrf.mxu1  ;;  %v793_v37 = vpop.f32.mrf.mxu0 }
 0x12e   : > { %v830_v25 = vpop.f32.mrf.mxu1  ;;  %v795_v39 = vpop.f32.mrf.mxu0 }
 0x12f   : > { %844 = vrot.lane.b32.xlu0 %v830_v25, %s1525_s11 }
 0x136   : > { %v833_v31 = vpop.f32.mrf.mxu1  ;;  %v798_v42 = vpop.f32.mrf.mxu0 }
 0x137   : > { %846 = vrot.lane.b32.xlu0 %v833_v31, %s1525_s11  ;;  %v1035_v31 = vld [vmem:[%s1677_s17 + $0x40] sm:$0xff] }
 0x13e   : > { %v835_v34 = vpop.f32.mrf.mxu1  ;;  %v800_v45 = vpop.f32.mrf.mxu0 }
 0x13f   : > { %848 = vrot.lane.b32.xlu1 %v835_v34, %s1525_s11  ;;  %878 = vperm.xlu0 %1448, %v871_v38   ;;  %v1032_v34 = vld [vmem:[%s1677_s17 + $0x28] sm:$0xff] }
 0x147   : > { %842 = vrot.lane.b32.xlu1 %v828_v17, %s1525_s11 }
 0x14f   : > { %883 = vperm.xlu1 %1449, %v872_v36   ;;  %v1031_v36 = vld [vmem:[%s1677_s17 + $0x20] sm:$0xff] }
 0x174   : > { %v982_v27 = vpop.trf.xlu2 }
 0x1a1   : > { %v845_v40 = vpop.permute.xlu0 %844 }
 0x1a2   : > { %v856_v41 = vsel %vm753_vm3, %v795_v39, %v845_v40  ;;  %v1030_v39 = vld [vmem:[%s1677_s17 + $0x18] sm:$0xff]  ;;  %v1029_v40 = vld [vmem:[%s1677_s17 + $0x10] sm:$0xff] }
 0x1a3   : > { %1373 = vmatmul.msk.f32.vlgmr.msra.gmra.mxu2 %vm903_vm4, %v856_v41  ;;  %v1028_v41 = vld [vmem:[%s1677_s17 + $0x8] sm:$0xff] }
 0x1a9   : > { %v847_v43 = vpop.permute.xlu0 %846 }
 0x1aa   : > { %v857_v44 = vsel %vm753_vm3, %v798_v42, %v847_v43  ;;  %v969_v42 = vld [vmem:[#allocation3 + $0x8] sm:$0xff] }
 0x1ab   : > { %1374 = vmatmul.msk.f32.gmra.mxu2 %vm903_vm4, %v857_v44 }
 0x1b1   : > { %v849_v46 = vpop.permute.xlu1 %848  ;;  %v879_v60 = vpop.permute.xlu0 %878 }
 0x1b2   : > { %v858_v47 = vsel %vm753_vm3, %v800_v45, %v849_v46  ;;  %v899_v1 = vmul.f32 %v1450_v52, %v879_v60 }
 0x1b3   : > { %1375 = vmatmul.msk.f32.gmra.mxu2 %vm903_vm4, %v858_v47  ;;  %v1027_v47 = vld [vmem:[%s1677_s17] sm:$0xff] }
 0x1b9   : > { %v843_v48 = vpop.permute.xlu1 %842 }
 0x1ba   : > { %v855_v49 = vsel %vm753_vm3, %v793_v37, %v843_v48 }
 0x1bb   : > { %1372 = vmatmul.msk.f32.vlgmr.msrb.gmra.mxu0 %vm903_vm4, %v855_v49 }
 0x1c1   : > { %v884_v53 = vpop.permute.xlu1 %883 }
 0x1c2   : > { %v900_v57 = vmul.f32 %v1450_v52, %v884_v53  ;;  %v1452_v52 = vld [vmem:[%s701_s28] ss:$0 sm:$0xff] }
 0x226   : > { %v936_v50 = vpop.f32.mrf.mxu2 }
 0x227   : > { %v937_v62 = vadd.f32 %v936_v50, %v900_v57 }
 0x229   : > { %v950_v4 = vadd.f32 %v1451_v61, %v937_v62 }
 0x22b   : > { %v957_v23 = vmax.f32 %v950_v4, 0.0 }
 0x22e   : > { %v939_v55 = vpop.f32.mrf.mxu2 }
 0x22f   : > { %v940_v58 = vadd.f32 %v939_v55, %v901_v56 }
 0x231   : > { %v951_v0 = vadd.f32 %v1451_v61, %v940_v58 }
 0x233   : > { %1453 = vtanh.f32 %v951_v0  ;;  %v958_v14 = vmax.f32 %v951_v0, 0.0 }
 0x236   : > { %v942_v2 = vpop.f32.mrf.mxu2 }
 0x237   : > { %v943_v3 = vadd.f32 %v942_v2, %v902_v63 }
 0x238   : > { %v933_v5 = vpop.f32.mrf.mxu0 }
 0x239   : > { %v952_v6 = vadd.f32 %v1451_v61, %v943_v3  ;;  %v934_v7 = vadd.f32 %v933_v5, %v899_v1  ;;  %v1454_v13 = vpop.eup %1453  ;;  %v1107_v3 = vld [vmem:[%s1880_s5] sm:$0x3] (%p1082_p6) }
 0x23a   : > { %v966_v19 = vsel %vm955_vm5, %v958_v14, %v1454_v13  ;;  %v1118_v5 = vld [vmem:[%s1883_s8 + $0x20] sm:$0xff] (%p1082_p6)  ;;  %v1151_v13 = vld [vmem:[%s1885_s10 + $0x18] sm:$0xff] (%p1082_p6) }
 0x23b   : > { %1455 = vtanh.f32 %v952_v6  ;;  %v949_v9 = vadd.f32 %v1451_v61, %v934_v7  ;;  %v959_v15 = vmax.f32 %v952_v6, 0.0  ;;  %v1089_v6 = vld [vmem:[%s1879_s4] sm:$0x1] (%p1082_p6)  ;;  %v1117_v7 = vld [vmem:[%s1883_s8 + $0x18] sm:$0xff] (%p1082_p6)  ;;  %1171 = vmatpush.msra.mxu2 (%p1082_p6), %v1151_v13 }
 0x23c   : > { %1457 = vtanh.f32 %v950_v4  ;;  %v1119_v4 = vld [vmem:[%s1883_s8 + $0x28] sm:$0xff] (%p1082_p6) }
 0x23d   : > { %1459 = vtanh.f32 %v949_v9  ;;  %v956_v18 = vmax.f32 %v949_v9, 0.0  ;;  %1137 = vmatpush.msra.mxu1 (%p1082_p6), %v1119_v4  ;;  %v1115_v9 = vld [vmem:[%s1883_s8 + $0x8] sm:$0xff] (%p1082_p6) }
 0x23f   : > { %1138 = vmatpush.msra.mxu1 (%p1082_p6), %v1118_v5 }
 0x241   : > { %v1456_v16 = vpop.eup %1455  ;;  %1139 = vmatpush.msra.mxu1 (%p1082_p6), %v1117_v7 }
 0x242   : > { %v1458_v17 = vpop.eup %1457  ;;  %v967_v20 = vsel %vm955_vm5, %v959_v15, %v1456_v16 }
 0x243   : > { %v1460_v21 = vpop.eup %1459  ;;  %v971_v22 = vpack.c.bf16 %v967_v20, %v966_v19  ;;  %v965_v25 = vsel %vm955_vm5, %v957_v23, %v1458_v17  ;;  %1140 = vmatpush.msra.mxu1 (%p1082_p6), %v1116_v8  ;;  %v1149_v19 = vld [vmem:[%s1885_s10 + $0x8] sm:$0xff] (%p1082_p6)  ;;  %v1148_v20 = vld [vmem:[%s1885_s10] sm:$0xff] (%p1082_p6) }
 0x244   : > { %v964_v24 = vsel %vm955_vm5, %v956_v18, %v1460_v21  ;;  %v1150_v18 = vld [vmem:[%s1885_s10 + $0x10] sm:$0xff] (%p1082_p6)  ;;  %v1466_v21 = vld [vmem:[%s1884_s9] ss:$0 sm:$0xff] (%p1082_p6) }
 0x245   : > { %1000 = vmatpush.bf16.msra.mxu3 %v971_v22  ;;  %v970_v26 = vpack.c.bf16 %v965_v25, %v964_v24  ;;  %1141 = vmatpush.msra.mxu1 (%p1082_p6), %v1115_v9 }
 0x246   : > { %1172 = vmatpush.msra.mxu2 (%p1082_p6), %v1150_v18 }
 0x247   : > { %1142 = vmatpush.msra.mxu1 (%p1082_p6), %v1114_v12 }
 0x248   : > { %1173 = vmatpush.msra.mxu2 (%p1082_p6), %v1149_v19 }
 0x249   : > { %1001 = vmatpush.bf16.msra.mxu3 %v970_v26 }
 0x24a   : > { %1174 = vmatpush.msra.mxu2 (%p1082_p6), %v1148_v20 }
 0x24c   : > { %1376 = vmatmul.msk.bf16.vlgmr.msra.gmra.mxu3 %vm990_vm6, %v982_v27  ;;  %v1467_v27 = vld [vmem:[#allocation4] ss:$0 sm:$0xff] (%p1082_p6) }
 0x24d   : > { %1053 = vmatpush.msrb.mxu3 %v1038_v28 }
 0x24f   : > { %1054 = vmatpush.msrb.mxu3 %v1037_v29 }
 0x251   : > { %1055 = vmatpush.msrb.mxu3 %v1036_v30 }
 0x253   : > { %1056 = vmatpush.msrb.mxu3 %v1035_v31 }
 0x255   : > { %1057 = vmatpush.msrb.mxu3 %v1034_v32 }
 0x257   : > { %1058 = vmatpush.msrb.mxu3 %v1033_v33 }
 0x259   : > { %1059 = vmatpush.msrb.mxu3 %v1032_v34 }
 0x25b   : > { %1060 = vmatpush.msrb.mxu3 %v1031_v36 }
 0x25d   : > { %1061 = vmatpush.msrb.mxu3 %v1030_v39 }
 0x25f   : > { %1062 = vmatpush.msrb.mxu3 %v1029_v40 }
 0x261   : > { %1063 = vmatpush.msrb.mxu3 %v1028_v41 }
 0x263   : > { %1064 = vmatpush.msrb.mxu3 %v1027_v47 }
 0x2cf   : > { %v1003_v37 = vpop.f32.mrf.mxu3 }
 0x2d0   : > { %v1008_v38 = vadd.f32 %v1003_v37, %v968_v35 }
 0x2d2   : > { %1010 = vst.msk [vmem:[#allocation3] sm:$0xff] %vm753_vm3, %v1008_v38 }
 0x2d7   : > { %v1005_v43 = vpop.f32.mrf.mxu3 }
 0x2d8   : > { %v1009_v44 = vadd.f32 %v1005_v43, %v969_v42 }
 0x2d9   : > { %v1015_v45 = vld [vmem:[#allocation3] sm:$0xff] }
 0x2da   : > { %1011 = vst.msk [vmem:[#allocation3 + $0x8] sm:$0xff] %vm753_vm3, %v1009_v44  ;;  %1019 = vrot.lane.b32.xlu1 %v1015_v45, %s1525_s11 }
 0x2e1   : > { %v1016_v46 = vld [vmem:[#allocation3 + $0x8] sm:$0xff] }
 0x2e2   : > { %1021 = vrot.lane.b32.xlu0 %v1016_v46, %s1525_s11  ;;  %s1528_s11 = smov (%p1082_p6), 96  }
 0x34c   : > { %v1020_v48 = vpop.permute.xlu1 %1019 }
 0x34d   : > { %v1025_v49 = vsel %vm753_vm3, %v1694_v10, %v1020_v48 }
 0x34e   : > { %1377 = vmatmul.msk.f32.vlgmr.msrb.gmra.mxu3 %vm903_vm4, %v1025_v49 }
 0x354   : > { %v1022_v50 = vpop.permute.xlu0 %1021 }
 0x355   : > { %v1026_v51 = vsel %vm753_vm3, %v1696_v11, %v1022_v50 }
 0x356   : > { %1378 = vmatmul.msk.f32.gmra.mxu3 %vm903_vm4, %v1026_v51 }
 0x3d1   : > { %v1066_v53 = vpop.f32.mrf.mxu3 }
 0x3d2   : > { %v1067_v54 = vadd.f32 %v1452_v52, %v1066_v53 }
 0x3d4   : > { %v1072_v55 = vadd.f32 %v1067_v54, %v1694_v10 }
 0x3d6   : > { %1461 = vtanh.f32 %v1072_v55  ;;  %v1074_v58 = vmax.f32 %v1072_v55, 0.0 }
 0x3d9   : > { %v1069_v56 = vpop.f32.mrf.mxu3 }
 0x3da   : > { %v1070_v57 = vadd.f32 %v1452_v52, %v1069_v56 }
 0x3dc   : > { %v1462_v59 = vpop.eup %1461  ;;  %v1073_v60 = vadd.f32 %v1070_v57, %v1696_v11  ;;  %v1527_v11 = vmov (%p1082_p6), 0  }
 0x3dd   : > { %v1078_v61 = vsel %vm955_vm5, %v1074_v58, %v1462_v59  ;;  %1465 = vset.pattern.permute.xlu0 (%p1082_p6), %v1527_v11 }
 0x3de   : > { %1080 = vst.msk [vmem:[#allocation2] sm:$0xff] %vm753_vm3, %v1078_v61  ;;  %1463 = vtanh.f32 %v1073_v60  ;;  %v1075_v62 = vmax.f32 %v1073_v60, 0.0  ;;  %1110 = vperm.xlu0 (%p1082_p6), %1465, %v1107_v3  }
 0x3e2   : > { %1086 = sbr.rel (!%p1082_p6) target bundleno = 1404 (0x57c), region = 104 }
 0x3e4   : > { %v1464_v63 = vpop.eup %1463 }
 0x3e5   : > { %v1079_v0 = vsel %vm955_vm5, %v1075_v62, %v1464_v63  ;;  %v1087_v10 = vld [vmem:[#allocation2] sm:$0xff] (%p1082_p6) }
 0x3e6   : > { %1081 = vst.msk [vmem:[#allocation2 + $0x8] sm:$0xff] %vm753_vm3, %v1079_v0  ;;  %1183 = vrot.lane.b32.xlu0 (%p1082_p6), %v1087_v10, %s1528_s11 }
 0x3ed   : > { %v1088_v1 = vld [vmem:[#allocation2 + $0x8] sm:$0xff] }
 0x3ee   : > { %v1090_v2 = vpack.c.bf16 %v1088_v1, %v1087_v10  ;;  %1185 = vrot.lane.b32.xlu1 %v1088_v1, %s1528_s11 }
 0x3f0   : > { %1101 = vmatpush.bf16.msra.mxu0 %v1090_v2 }
 0x3f3   : > { %1380 = vmatmul.msk.bf16.vlgmr.msra.gmra.mxu0 %vm777_vm2, %v1089_v6 }
 0x450   : > { %v1111_v14 = vpop.permute.xlu0 %1110 }
 0x458   : > { %v1184_v26 = vpop.permute.xlu0 %1183 }
 0x459   : > { %1189 = vst.msk [vmem:[#allocation5] sm:$0xff] %vm777_vm2, %v1184_v26 }
 0x460   : > { %v1186_v25 = vpop.permute.xlu1 %1185 }
 0x461   : > { %1190 = vst.msk [vmem:[#allocation5 + $0x8] sm:$0xff] %vm777_vm2, %v1186_v25 }
 0x470   : > { %v1103_v15 = vpop.f32.mrf.mxu0 }
 0x471   : > { %v1113_v16 = vmul.f32 %v1111_v14, %v1103_v15 }
 0x473   : > { %1381 = vmatmul.msk.f32.vlgmr.msra.gmra.mxu1 %vm753_vm3, %v1113_v16 }
 0x478   : > { %v1105_v17 = vpop.f32.mrf.mxu0 }
 0x4f0   : > { %v1144_v22 = vpop.f32.mrf.mxu1 }
 0x4f1   : > { %v1145_v23 = vadd.f32 %v1466_v21, %v1144_v22 }
 0x4f3   : > { %v1147_v24 = vmax.f32 %v1145_v23, 0.0 }
 0x4f5   : > { %1382 = vmatmul.msk.f32.vlgmr.msra.gmra.mxu2 %vm990_vm6, %v1147_v24 }
 0x578   : > { %v1176_v28 = vpop.f32.mrf.mxu2 }
 0x579   : > { %v1177_v29 = vadd.f32 %v1467_v27, %v1176_v28 }
 0x57b   : > { %1180 = vst.msk [vmem:[%s1910_s25] sm:$0x3] %vm1179_vm7, %v1177_v29 }
 0x57c PF: > { %s1911_s17 = sld [smem:[#allocation9_spill]]  ;;  %s1529_s0 = smov [#allocation5]  }
 0x57d   : > { %s1913_s27 = sld [smem:[#allocation15_spill]]  ;;  %s1199_s29 = sshll.u32 %s1529_s0, 4  ;;  %s1200_s29 = int_to_ptr.vmem [resolvable:$true] %s1199_s29 }
 0x57e   : > { %s1530_s20 = smov 128   ;;  %s1531_s30 = smov 8  }
 0x582   : > { %s1912_s1 = sadd.s32 4294967295, %s1911_s17  }
 0x583   : > { %p1412_p7 = scmp.eq.s32.totalorder %s1912_s1, 1  ;;  %s1201_s18 = sshll.u32 %s1913_s27, 4  ;;  %s1202_s18 = int_to_ptr.hbm [resolvable:$true] %s1201_s18 }
 0x585   : > { %1409 = dma.vmem_to_hbm [thread:$0]  (%p1412_p7), %s1200_s29, 256, %s1202_s18, [#allocation6], %s1530_s20, %s1530_s20, %s1531_s30  }
 0x586   : > { %1509 = dma.done.wait (%p1412_p7), [#allocation6], 256  }
 0x587   : > { %1511 = vsyncadd (%p1412_p7), [#allocation6], 4294967040 }
 0x588 PF: > { %s1914_s21 = sld [smem:[#allocation9_spill]] }
 0x589   : > { %s1915_s29 = sld [smem:[#allocation8_spill]] }
 0x58a   : > { %s1916_s30 = sld [smem:[#allocation10_spill]] }
 0x58e   : > { %s32_s0 = sadd.s32 1, %s1914_s21  }
 0x58f   : > { %p29_p8 = scmp.ge.s32.totalorder %s32_s0, 4  }
 0x591   :  { %31 = sbr.rel (!%p29_p8) target bundleno = 8 (0x8), region = 160 }
 0x596   :  { %1221 = vsyncpa [#allocation6], 1 }
 0x597   :  { %1223 = vsyncpa [#allocation6 + $0x1], 1 }

</bundles_post_ra>
